<compile_context>
chip_gen: v5e
topology: v5e:2x2
jax: 0.10.0
libtpu: 0.0.40
codegen_flags: <defaults>
</compile_context>

<pallas_src>
import jax
import jax.numpy as jnp
from jax import lax
from jax.experimental import pallas as pl
from jax.experimental.pallas import tpu as pltpu


def _round_up(x, m):
    return ((x + m - 1) // m) * m


# ---------------------------------------------------------------------------
# Kernel: grid = (batch_tiles, T // K).  out_ref is the VMEM-resident hidden
# state; each grid step runs K recurrence steps with an unrolled inner loop.
# ---------------------------------------------------------------------------
def gru_seq_kernel(x_ref, h0_ref, w_ref, p_ref, out_ref):
    """K recurrence steps per grid invocation.

    x_ref  : (K, BT, 5*Hp)  lanes per step: [gx_r | gx_u | gx_c | xk | ts]
                            (all h-independent terms, precomputed)
    h0_ref : (BT, Hp)       initial hidden state (padded); constant over T
    w_ref  : (Hp, 3*Hp)     columns: [h->r | h->u | (r*h)->c], zero padded
    p_ref  : (8, Hp)        rows: 0 = _time_history_w1, 1 = _time_kernel_w2
    out_ref: (BT, Hp)       hidden state, resident across the T grid axis
    """
    tt = pl.program_id(1)
    Hp = h0_ref.shape[1]
    K = x_ref.shape[0]

    @pl.when(tt == 0)
    def _():
        out_ref[...] = h0_ref[...]

    th_w1 = p_ref[0:1, :]
    tk_w2 = p_ref[1:2, :]

    def step(k, h):
        gx_r = x_ref[k, :, 0:Hp]
        gx_u = x_ref[k, :, Hp:2 * Hp]
        gx_c = x_ref[k, :, 2 * Hp:3 * Hp]
        xk = x_ref[k, :, 3 * Hp:4 * Hp]
        ts = x_ref[k, :, 4 * Hp:5 * Hp]

        # Only the h-dependent matmuls live on the serial path.
        gh = jnp.dot(h, w_ref[:, 0:2 * Hp], preferred_element_type=jnp.float32)
        r = jax.nn.sigmoid(gx_r + gh[:, 0:Hp])
        u = jax.nn.sigmoid(gx_u + gh[:, Hp:2 * Hp])
        c = jnp.tanh(gx_c + jnp.dot(r * h, w_ref[:, 2 * Hp:3 * Hp],
                                    preferred_element_type=jnp.float32))

        tlw = jax.nn.relu(xk + h * th_w1)
        new_gate = jax.nn.sigmoid(tk_w2 * tlw + ts)
        return u * h + (1.0 - u) * c * new_gate

    out_ref[...] = lax.fori_loop(0, K, step, out_ref[...], unroll=True)


# ---------------------------------------------------------------------------
# One-time parameter packing (transpose / split / pad done once, not per call).
# ---------------------------------------------------------------------------
def pack_params(params, hidden_size):
    H = hidden_size
    Hp = _round_up(max(H, 128), 128)
    f32 = jnp.float32

    def xh_split(W):  # nn.Linear weight (H, 2H): y = [x, h] @ W.T
        WT = W.T.astype(f32)  # (2H, H)
        return WT[:H, :], WT[H:, :]

    wrx, wrh = xh_split(params["W_r"])
    wux, wuh = xh_split(params["W_u"])
    wcx, wch = xh_split(params["W_c"])

    def pad_mat(m):  # (H, H) -> (Hp, Hp), zero padded
        return jnp.zeros((Hp, Hp), f32).at[:H, :H].set(m)

    packed = {
        # --- used by the batched XLA pre-pass (h-independent), unpadded ---
        "wx_all": jnp.concatenate([wrx, wux, wcx], axis=1),                    # (H, 3H)
        "bx_all": jnp.concatenate([params["b_r"], params["b_u"],
                                   params["b_c"]]).astype(f32),                # (3H,)
        "tk_w1": params["_time_kernel_w1"].astype(f32),
        "tk_b1": params["_time_kernel_b1"].astype(f32),
        "t_w1": params["_time_w1"].astype(f32),
        "t_b1": params["_time_b1"].astype(f32),
        "t_w12": params["_time_w12"].astype(f32),
        "t_b12": params["_time_b12"].astype(f32),
        # --- used inside the kernel (h-dependent), padded lane-dense ---
        "w_h": jnp.concatenate([pad_mat(wrh), pad_mat(wuh), pad_mat(wch)],
                               axis=1),                                        # (Hp, 3Hp)
    }
    pvec = jnp.zeros((8, Hp), f32)
    pvec = pvec.at[0, :H].set(params["_time_history_w1"].astype(f32))
    pvec = pvec.at[1, :H].set(params["_time_kernel_w2"].astype(f32))
    packed["pvec"] = pvec
    return packed


# ---------------------------------------------------------------------------
# Wrappers.
# ---------------------------------------------------------------------------
@jax.jit
def gru_sequence_forward(seq_inputs, state0, packed):
    """Run the recurrence over a whole (T, B, H+1) sequence.

    All h-independent terms are precomputed in one batched pre-pass; the
    serial recurrence runs in a single pallas_call. Returns (B, H) final state.
    """
    T, B, _ = seq_inputs.shape
    H = state0.shape[1]
    Hp = packed["w_h"].shape[0]

    # Batch tile: fill the MXU rows when the real batch allows.
    # NOTE(v7x): pick BT <= Bp // 2 when B permits so the "parallel" batch
    # axis has >= 2 tiles and both TensorCores get work.
    BT = min(_round_up(B, 8), 256)
    Bp = _round_up(B, BT)

    # Timesteps per grid step (amortize per-grid-step overhead).
    K = 1
    for cand in (16, 8, 4, 2):
        if T % cand == 0:
            K = cand
            break

    # ---- h-independent pre-pass (one big matmul over all T*B rows) --------
    x = seq_inputs[:, :, :H].astype(jnp.float32)          # (T, B, H)
    dt = seq_inputs[:, :, H:H + 1].astype(jnp.float32)    # (T, B, 1)

    gx = jnp.einsum("tbh,hg->tbg", x, packed["wx_all"]) + packed["bx_all"]   # (T, B, 3H)
    xk = x * packed["tk_w1"] + packed["tk_b1"]                               # (T, B, H)
    ts = (packed["t_w12"] * jax.nn.relu(packed["t_w1"] * dt + packed["t_b1"])
          + packed["t_b12"])                                                 # (T, B, H)

    def pad3(a):  # (T, B, h) -> (T, Bp, Hp), fused zero pad
        return jnp.pad(a, ((0, 0), (0, Bp - B), (0, Hp - a.shape[-1])))

    xin = jnp.concatenate(
        [pad3(gx[..., 0:H]), pad3(gx[..., H:2 * H]), pad3(gx[..., 2 * H:3 * H]),
         pad3(xk), pad3(ts)], axis=-1)                                       # (T, Bp, 5*Hp)

    h0p = jnp.pad(state0.astype(jnp.float32), ((0, Bp - B), (0, Hp - H)))    # (Bp, Hp)

    # Explicit scoped-VMEM request: double-buffered blocks + resident output.
    f32b = 4
    vmem_need = f32b * (2 * K * BT * 5 * Hp + 2 * BT * Hp
                        + 2 * Hp * 3 * Hp + 2 * 8 * Hp + 2 * BT * Hp)
    vmem_limit = int(min(max(2 * vmem_need, 32 * 1024 * 1024), 96 * 1024 * 1024))

    grid = (Bp // BT, T // K)
    out = pl.pallas_call(
        gru_seq_kernel,
        out_shape=jax.ShapeDtypeStruct((Bp, Hp), jnp.float32),
        grid_spec=pltpu.PrefetchScalarGridSpec(
            num_scalar_prefetch=0,
            grid=grid,
            in_specs=[
                pl.BlockSpec((K, BT, 5 * Hp), lambda b, t: (t, b, 0)),  # per-step slab
                pl.BlockSpec((BT, Hp), lambda b, t: (b, 0)),            # h0 (constant over T)
                pl.BlockSpec((Hp, 3 * Hp), lambda b, t: (0, 0)),        # h-side weights (resident)
                pl.BlockSpec((8, Hp), lambda b, t: (0, 0)),             # th_w1 / tk_w2
            ],
            out_specs=pl.BlockSpec((BT, Hp), lambda b, t: (b, 0)),      # resident hidden state
        ),
        compiler_params=pltpu.CompilerParams(
            dimension_semantics=("parallel", "arbitrary"),
            vmem_limit_bytes=vmem_limit),
        input_output_aliases={1: 0},  # reuse the h0 buffer for the final state
    )(xin, h0p, packed["w_h"], packed["pvec"])

    return out[:B, :H]


def modified_gru_cell(inputs, state, packed):
    """Single-step forward matching the PyTorch module: returns (new_h, new_h)."""
    new_h = gru_sequence_forward(inputs[None], state, packed)
    return new_h, new_h


# ---------------------------------------------------------------------------
# Plain-JAX reference (mirrors the PyTorch module exactly).
# ---------------------------------------------------------------------------
def reference_forward(inputs, state, params):
    H = state.shape[1]
    t = inputs[:, -1].reshape(-1, 1)
    x = inputs[:, :H]
    gate_in = jnp.concatenate([x, state], axis=1)
    r = jax.nn.sigmoid(gate_in @ params["W_r"].T + params["b_r"])
    u = jax.nn.sigmoid(gate_in @ params["W_u"].T + params["b_u"])
    r_state = r * state
    c = jnp.tanh(jnp.concatenate([x, r_state], axis=1) @ params["W_c"].T + params["b_c"])
    tlw = jax.nn.relu(x * params["_time_kernel_w1"]
                      + state * params["_time_history_w1"]
                      + params["_time_kernel_b1"])
    tls = jax.nn.relu(params["_time_w1"] * t + params["_time_b1"])
    new_gate = jax.nn.sigmoid(params["_time_kernel_w2"] * tlw
                              + params["_time_w12"] * tls
                              + params["_time_b12"])
    return u * state + (1.0 - u) * c * new_gate


def init_params(key, hidden_size):
    H = hidden_size
    ks = jax.random.split(key, 6)
    scale = 1.0 / jnp.sqrt(2.0 * H)
    return {
        "W_r": jax.random.uniform(ks[0], (H, 2 * H), jnp.float32, -scale, scale),
        "b_r": jax.random.uniform(ks[1], (H,), jnp.float32, -scale, scale),
        "W_u": jax.random.uniform(ks[2], (H, 2 * H), jnp.float32, -scale, scale),
        "b_u": jax.random.uniform(ks[3], (H,), jnp.float32, -scale, scale),
        "W_c": jax.random.uniform(ks[4], (H, 2 * H), jnp.float32, -scale, scale),
        "b_c": jax.random.uniform(ks[5], (H,), jnp.float32, -scale, scale),
        # Time-aware parameters initialized to ones, as in the module's __init__.
        "_time_kernel_w1": jnp.ones((H,), jnp.float32),
        "_time_kernel_b1": jnp.ones((H,), jnp.float32),
        "_time_history_w1": jnp.ones((H,), jnp.float32),
        "_time_w1": jnp.ones((H,), jnp.float32),
        "_time_b1": jnp.ones((H,), jnp.float32),
        "_time_kernel_w2": jnp.ones((H,), jnp.float32),
        "_time_w12": jnp.ones((H,), jnp.float32),
        "_time_b12": jnp.ones((H,), jnp.float32),
    }


if __name__ == "__main__":
    B, H, T = 4, 32, 8  # batch, hidden/embedding size, sequence length
    key = jax.random.PRNGKey(0)
    k_seq, k_h, k_p = jax.random.split(key, 3)

    seq_inputs = jax.random.normal(k_seq, (T, B, H + 1), jnp.float32)  # last col = time interval
    state0 = jax.random.normal(k_h, (B, H), jnp.float32)
    params = init_params(k_p, H)

    # One-time parameter packing (pre-transposed, padded, fused slabs).
    packed = pack_params(params, H)

    # 1) single step (module semantics)
    new_h, new_state = modified_gru_cell(seq_inputs[0], state0, packed)
    new_h = jax.block_until_ready(new_h)
    ref_step = reference_forward(seq_inputs[0], state0, params)
    assert new_h.shape == (B, H)
    assert jnp.allclose(new_h, ref_step, atol=1e-5, rtol=1e-5), "single-step mismatch"

    # 2) full recurrence fused into one pallas_call
    final_h = gru_sequence_forward(seq_inputs, state0, packed)
    final_h = jax.block_until_ready(final_h)
    href = state0
    for s in range(T):
        href = reference_forward(seq_inputs[s], href, params)
    assert final_h.shape == (B, H)
    assert jnp.allclose(final_h, href, atol=1e-4, rtol=1e-4), "sequence mismatch"

    print("KERNEL_OK")
</pallas_src>

<mosaic_0001>
module attributes {stable_mosaic.version = 11 : i64} {
  func.func @gru_seq_kernel(%arg0: i32, %arg1: i32, %arg2: memref<1x8x640xf32, #tpu.memory_space<vmem>>, %arg3: memref<8x128xf32, #tpu.memory_space<vmem>>, %arg4: memref<128x384xf32, #tpu.memory_space<vmem>>, %arg5: memref<8x128xf32, #tpu.memory_space<vmem>>, %arg6: memref<8x128xf32, #tpu.memory_space<vmem>>) attributes {dimension_semantics = [#tpu.dimension_semantics<parallel>, #tpu.dimension_semantics<arbitrary>], iteration_bounds = array<i64: 1, 1>, scalar_prefetch = 0 : i64, scratch_operands = 0 : i64, tpu.core_type = #tpu.core_type<tc>, window_params = [{transform_indices = @transform_0, window_bounds = array<i64: 1, 8, 640>}, {transform_indices = @transform_1, window_bounds = array<i64: 8, 128>}, {pipeline_mode = #tpu.pipeline_mode<synchronous>, transform_indices = @transform_2, window_bounds = array<i64: 128, 384>}, {pipeline_mode = #tpu.pipeline_mode<synchronous>, transform_indices = @transform_3, window_bounds = array<i64: 8, 128>}, {transform_indices = @transform_4, window_bounds = array<i64: 8, 128>}]} {
    %c0_i32 = arith.constant 0 : i32
    %0 = arith.cmpi eq, %arg1, %c0_i32 : i32
    %1 = arith.extui %0 : i1 to i32
    %c0_i32_0 = arith.constant 0 : i32
    %2 = arith.cmpi ne, %1, %c0_i32_0 : i32
    scf.if %2 {
      %c0_24 = arith.constant 0 : index
      %c0_25 = arith.constant 0 : index
      %62 = vector.load %arg3[%c0_24, %c0_25] : memref<8x128xf32, #tpu.memory_space<vmem>>, vector<8x128xf32>
      %c0_26 = arith.constant 0 : index
      %c0_27 = arith.constant 0 : index
      %63 = vector.load %arg6[%c0_26, %c0_27] : memref<8x128xf32, #tpu.memory_space<vmem>>, vector<8x128xf32>
      tpu.vector_store %arg6[%c0_26, %c0_27], %62 {strides = array<i32>} : memref<8x128xf32, #tpu.memory_space<vmem>>, vector<8x128xf32>,
    } else {
    }
    %c0 = arith.constant 0 : index
    %c0_1 = arith.constant 0 : index
    %3 = vector.load %arg5[%c0, %c0_1] : memref<8x128xf32, #tpu.memory_space<vmem>>, vector<1x128xf32>
    %c1 = arith.constant 1 : index
    %c0_2 = arith.constant 0 : index
    %4 = vector.load %arg5[%c1, %c0_2] : memref<8x128xf32, #tpu.memory_space<vmem>>, vector<1x128xf32>
    %c0_3 = arith.constant 0 : index
    %c0_4 = arith.constant 0 : index
    %5 = vector.load %arg6[%c0_3, %c0_4] : memref<8x128xf32, #tpu.memory_space<vmem>>, vector<8x128xf32>
    %c0_i32_5 = arith.constant 0 : i32
    %6 = arith.index_cast %c0_i32_5 : i32 to index
    %c0_6 = arith.constant 0 : index
    %c0_7 = arith.constant 0 : index
    %7 = vector.load %arg2[%6, %c0_6, %c0_7] : memref<1x8x640xf32, #tpu.memory_space<vmem>>, vector<1x8x128xf32>
    %8 = vector.shape_cast %7 : vector<1x8x128xf32> to vector<8x128xf32>
    %9 = arith.index_cast %c0_i32_5 : i32 to index
    %c0_8 = arith.constant 0 : index
    %c128 = arith.constant 128 : index
    %10 = vector.load %arg2[%9, %c0_8, %c128] : memref<1x8x640xf32, #tpu.memory_space<vmem>>, vector<1x8x128xf32>
    %11 = vector.shape_cast %10 : vector<1x8x128xf32> to vector<8x128xf32>
    %12 = arith.index_cast %c0_i32_5 : i32 to index
    %c0_9 = arith.constant 0 : index
    %c256 = arith.constant 256 : index
    %13 = vector.load %arg2[%12, %c0_9, %c256] : memref<1x8x640xf32, #tpu.memory_space<vmem>>, vector<1x8x128xf32>
    %14 = vector.shape_cast %13 : vector<1x8x128xf32> to vector<8x128xf32>
    %15 = arith.index_cast %c0_i32_5 : i32 to index
    %c0_10 = arith.constant 0 : index
    %c384 = arith.constant 384 : index
    %16 = vector.load %arg2[%15, %c0_10, %c384] : memref<1x8x640xf32, #tpu.memory_space<vmem>>, vector<1x8x128xf32>
    %17 = vector.shape_cast %16 : vector<1x8x128xf32> to vector<8x128xf32>
    %18 = arith.index_cast %c0_i32_5 : i32 to index
    %c0_11 = arith.constant 0 : index
    %c512 = arith.constant 512 : index
    %19 = vector.load %arg2[%18, %c0_11, %c512] : memref<1x8x640xf32, #tpu.memory_space<vmem>>, vector<1x8x128xf32>
    %20 = vector.shape_cast %19 : vector<1x8x128xf32> to vector<8x128xf32>
    %c0_12 = arith.constant 0 : index
    %c0_13 = arith.constant 0 : index
    %21 = vector.load %arg4[%c0_12, %c0_13] : memref<128x384xf32, #tpu.memory_space<vmem>>, vector<128x256xf32>
    %cst = arith.constant dense<0.000000e+00> : vector<8x256xf32>
    %22 = tpu.matmul %5, %21, %cst {dimension_numbers = #tpu.dot_dimension_numbers<[1], [0], [0], [1], [0, 0, 1, 1], [], []>} : vector<8x128xf32>, vector<128x256xf32>, vector<8x256xf32> -> vector<8x256xf32>
    %23 = vector.extract_strided_slice %22 {offsets = [0, 0], sizes = [8, 128], strides = [1, 1]} : vector<8x256xf32> to vector<8x128xf32>
    %24 = arith.addf %8, %23 : vector<8x128xf32>
    %25 = arith.negf %24 : vector<8x128xf32>
    %26 = math.exp %25 : vector<8x128xf32>
    %cst_14 = arith.constant 1.000000e+00 : f32
    %27 = vector.broadcast %cst_14 : f32 to vector<8x128xf32>
    %28 = arith.addf %27, %26 : vector<8x128xf32>
    %29 = arith.divf %27, %28 : vector<8x128xf32>
    %30 = vector.extract_strided_slice %22 {offsets = [0, 128], sizes = [8, 128], strides = [1, 1]} : vector<8x256xf32> to vector<8x128xf32>
    %31 = arith.addf %11, %30 : vector<8x128xf32>
    %32 = arith.negf %31 : vector<8x128xf32>
    %33 = math.exp %32 : vector<8x128xf32>
    %cst_15 = arith.constant 1.000000e+00 : f32
    %34 = vector.broadcast %cst_15 : f32 to vector<8x128xf32>
    %35 = arith.addf %34, %33 : vector<8x128xf32>
    %36 = arith.divf %34, %35 : vector<8x128xf32>
    %37 = arith.mulf %29, %5 : vector<8x128xf32>
    %c0_16 = arith.constant 0 : index
    %c256_17 = arith.constant 256 : index
    %38 = vector.load %arg4[%c0_16, %c256_17] : memref<128x384xf32, #tpu.memory_space<vmem>>, vector<128x128xf32>
    %cst_18 = arith.constant dense<0.000000e+00> : vector<8x128xf32>
    %39 = tpu.matmul %37, %38, %cst_18 {dimension_numbers = #tpu.dot_dimension_numbers<[1], [0], [0], [1], [0, 0, 1, 1], [], []>} : vector<8x128xf32>, vector<128x128xf32>, vector<8x128xf32> -> vector<8x128xf32>
    %40 = arith.addf %14, %39 : vector<8x128xf32>
    %41 = math.tanh %40 : vector<8x128xf32>
    %42 = vector.broadcast %3 : vector<1x128xf32> to vector<8x128xf32>
    %43 = arith.mulf %5, %42 : vector<8x128xf32>
    %44 = arith.addf %17, %43 : vector<8x128xf32>
    %cst_19 = arith.constant 0.000000e+00 : f32
    %45 = vector.broadcast %cst_19 : f32 to vector<8x128xf32>
    %46 = arith.maximumf %44, %45 : vector<8x128xf32>
    %47 = vector.broadcast %4 : vector<1x128xf32> to vector<8x128xf32>
    %48 = arith.mulf %47, %46 : vector<8x128xf32>
    %49 = arith.addf %48, %20 : vector<8x128xf32>
    %50 = arith.negf %49 : vector<8x128xf32>
    %51 = math.exp %50 : vector<8x128xf32>
    %cst_20 = arith.constant 1.000000e+00 : f32
    %52 = vector.broadcast %cst_20 : f32 to vector<8x128xf32>
    %53 = arith.addf %52, %51 : vector<8x128xf32>
    %54 = arith.divf %52, %53 : vector<8x128xf32>
    %55 = arith.mulf %36, %5 : vector<8x128xf32>
    %cst_21 = arith.constant 1.000000e+00 : f32
    %56 = vector.broadcast %cst_21 : f32 to vector<8x128xf32>
    %57 = arith.subf %56, %36 : vector<8x128xf32>
    %58 = arith.mulf %57, %41 : vector<8x128xf32>
    %59 = arith.mulf %58, %54 : vector<8x128xf32>
    %60 = arith.addf %55, %59 : vector<8x128xf32>
    %c1_i32 = arith.constant 1 : i32
    %c0_22 = arith.constant 0 : index
    %c0_23 = arith.constant 0 : index
    %61 = vector.load %arg6[%c0_22, %c0_23] : memref<8x128xf32, #tpu.memory_space<vmem>>, vector<8x128xf32>
    tpu.vector_store %arg6[%c0_22, %c0_23], %60 {strides = array<i32>} : memref<8x128xf32, #tpu.memory_space<vmem>>, vector<8x128xf32>,
    return
  }
  func.func @transform_0(%arg0: i32, %arg1: i32) -> (i32, i32, i32) {
    %c0_i32 = arith.constant 0 : i32
    %c0_i32_0 = arith.constant 0 : i32
    return %arg1, %arg0, %c0_i32 : i32, i32, i32
  }
  func.func @transform_1(%arg0: i32, %arg1: i32) -> (i32, i32) {
    %c0_i32 = arith.constant 0 : i32
    %c0_i32_0 = arith.constant 0 : i32
    return %arg0, %c0_i32 : i32, i32
  }
  func.func @transform_2(%arg0: i32, %arg1: i32) -> (i32, i32) {
    %c0_i32 = arith.constant 0 : i32
    %c0_i32_0 = arith.constant 0 : i32
    %c0_i32_1 = arith.constant 0 : i32
    return %c0_i32, %c0_i32_0 : i32, i32
  }
  func.func @transform_3(%arg0: i32, %arg1: i32) -> (i32, i32) {
    %c0_i32 = arith.constant 0 : i32
    %c0_i32_0 = arith.constant 0 : i32
    %c0_i32_1 = arith.constant 0 : i32
    return %c0_i32, %c0_i32_0 : i32, i32
  }
  func.func @transform_4(%arg0: i32, %arg1: i32) -> (i32, i32) {
    %c0_i32 = arith.constant 0 : i32
    %c0_i32_0 = arith.constant 0 : i32
    return %arg0, %c0_i32 : i32, i32
  }
}

</mosaic_0001>

<bundles_post_ra>
// kernel: gru_sequence_forward.1
= control target key start
LH: loop header
LB: loop body
LE: loop exit
PB: predicated region body
PF: predicated region fallthrough
CT: control target
= control target key end

     0   :  { %9 = vsyncpa [#allocation3], 0  ;;  %s283_s18 = smov [#allocation2]   ;;  %s284_s20 = smov 384   ;;  %s348_s0 = inlined_call_operand.vmem [shape: f32[1,8,640], index: 0, kind: input, shape index: {}]   ;;  %s349_s1 = inlined_call_operand.vmem [shape: f32[8,128], index: 1, kind: input, shape index: {}, may-alias: {1,4}]   ;;  %s350_s2 = inlined_call_operand.hbm [shape: f32[128,384], index: 2, kind: input, shape index: {}]   ;;  %s351_s3 = inlined_call_operand.vmem [shape: f32[8,128], index: 3, kind: input, shape index: {}]   ;;  %s352_s4 = inlined_call_operand.vmem [shape: f32[8,128], index: 4, kind: output, shape index: {}, may-alias: {1,4}]  }
   0x1   :  { %s18_s17 = sshll.u32 %s350_s2, 4  ;;  %s20_s19 = sshll.u32 %s283_s18, 4  ;;  %s19_s17 = int_to_ptr.hbm [resolvable:$true] %s18_s17  ;;  %s21_s19 = int_to_ptr.vmem [resolvable:$true] %s20_s19 }
   0x2   :  { %s285_s21 = smov 24  }
   0x3   :  { %26 = dma.hbm_to_vmem [thread:$0]  %s19_s17, 6144, %s21_s19, [#allocation3], %s284_s20, %s284_s20, %s285_s21  }
   0x4   :  { %281 = dma.done.wait [#allocation3], 6144  }
   0x5   :  { %282 = vsyncadd [#allocation3], 4294961152  ;;  %v77_v0 = vld [vmem:[#allocation2 + $0x168] sm:$0xff]  ;;  %v75_v1 = vld [vmem:[#allocation2 + $0x150] sm:$0xff] }
   0x6   :  { %79 = vmatpush.msra.mxu0 %v77_v0  ;;  %v73_v2 = vld [vmem:[#allocation2 + $0x138] sm:$0xff]  ;;  %v71_v3 = vld [vmem:[#allocation2 + $0x120] sm:$0xff]  ;;  %v69_v4 = vld [vmem:[#allocation2 + $0x108] sm:$0xff] }
   0x7   :  { %v78_v5 = vld [vmem:[#allocation2 + $0x170] sm:$0xff]  ;;  %v76_v7 = vld [vmem:[#allocation2 + $0x158] sm:$0xff]  ;;  %v74_v8 = vld [vmem:[#allocation2 + $0x140] sm:$0xff] }
   0x8   :  { %80 = vmatpush.msra.mxu0 %v75_v1  ;;  %v67_v6 = vld [vmem:[#allocation2 + $0xf0] sm:$0xff]  ;;  %99 = vmatpush.msra.mxu1 %v78_v5  ;;  %v65_v9 = vld [vmem:[#allocation2 + $0xd8] sm:$0xff]  ;;  %v72_v10 = vld [vmem:[#allocation2 + $0x128] sm:$0xff] }
   0x9   :  { %v63_v11 = vld [vmem:[#allocation2 + $0xc0] sm:$0xff]  ;;  %v70_v12 = vld [vmem:[#allocation2 + $0x110] sm:$0xff]  ;;  %v61_v13 = vld [vmem:[#allocation2 + $0xa8] sm:$0xff] }
   0xa   :  { %81 = vmatpush.msra.mxu0 %v73_v2  ;;  %100 = vmatpush.msra.mxu1 %v76_v7  ;;  %v68_v14 = vld [vmem:[#allocation2 + $0xf8] sm:$0xff]  ;;  %v59_v15 = vld [vmem:[#allocation2 + $0x90] sm:$0xff]  ;;  %v66_v16 = vld [vmem:[#allocation2 + $0xe0] sm:$0xff] }
   0xb   :  { %v57_v17 = vld [vmem:[#allocation2 + $0x78] sm:$0xff]  ;;  %v64_v18 = vld [vmem:[#allocation2 + $0xc8] sm:$0xff]  ;;  %v55_v19 = vld [vmem:[#allocation2 + $0x60] sm:$0xff] }
   0xc   :  { %82 = vmatpush.msra.mxu0 %v71_v3  ;;  %101 = vmatpush.msra.mxu1 %v74_v8  ;;  %v62_v20 = vld [vmem:[#allocation2 + $0xb0] sm:$0xff]  ;;  %v53_v21 = vld [vmem:[#allocation2 + $0x48] sm:$0xff]  ;;  %v60_v22 = vld [vmem:[#allocation2 + $0x98] sm:$0xff] }
   0xd   :  { %v51_v23 = vld [vmem:[#allocation2 + $0x30] sm:$0xff]  ;;  %v58_v24 = vld [vmem:[#allocation2 + $0x80] sm:$0xff]  ;;  %v49_v25 = vld [vmem:[#allocation2 + $0x18] sm:$0xff] }
   0xe   :  { %83 = vmatpush.msra.mxu0 %v69_v4  ;;  %102 = vmatpush.msra.mxu1 %v72_v10  ;;  %v56_v26 = vld [vmem:[#allocation2 + $0x68] sm:$0xff]  ;;  %v47_v27 = vld [vmem:[#allocation2] sm:$0xff]  ;;  %v54_v29 = vld [vmem:[#allocation2 + $0x50] sm:$0xff] }
   0xf   :  { %v317_v28 = vld [vmem:[%s349_s1] sm:$0xff]  ;;  %v52_v30 = vld [vmem:[#allocation2 + $0x38] sm:$0xff]  ;;  %v48_v32 = vld [vmem:[#allocation2 + $0x8] sm:$0xff] }
  0x10   :  { %84 = vmatpush.msra.mxu0 %v67_v6  ;;  %103 = vmatpush.msra.mxu1 %v70_v12  ;;  %v50_v31 = vld [vmem:[#allocation2 + $0x20] sm:$0xff]  ;;  %v175_v33 = vld [vmem:[#allocation2 + $0x178] sm:$0xff]  ;;  %v173_v35 = vld [vmem:[#allocation2 + $0x148] sm:$0xff] }
  0x11   :  { %176 = vmatpush.msra.mxu2 %v175_v33  ;;  %v174_v34 = vld [vmem:[#allocation2 + $0x160] sm:$0xff]  ;;  %v172_v36 = vld [vmem:[#allocation2 + $0x130] sm:$0xff]  ;;  %v171_v37 = vld [vmem:[#allocation2 + $0x118] sm:$0xff] }
  0x12   :  { %85 = vmatpush.msra.mxu0 %v65_v9  ;;  %104 = vmatpush.msra.mxu1 %v68_v14  ;;  %v170_v38 = vld [vmem:[#allocation2 + $0x100] sm:$0xff]  ;;  %v169_v39 = vld [vmem:[#allocation2 + $0xe8] sm:$0xff]  ;;  %v168_v40 = vld [vmem:[#allocation2 + $0xd0] sm:$0xff] }
  0x13   :  { %177 = vmatpush.msra.mxu2 %v174_v34  ;;  %v167_v41 = vld [vmem:[#allocation2 + $0xb8] sm:$0xff]  ;;  %v166_v42 = vld [vmem:[#allocation2 + $0xa0] sm:$0xff]  ;;  %v165_v43 = vld [vmem:[#allocation2 + $0x88] sm:$0xff] }
  0x14   :  { %86 = vmatpush.msra.mxu0 %v63_v11  ;;  %105 = vmatpush.msra.mxu1 %v66_v16  ;;  %v164_v44 = vld [vmem:[#allocation2 + $0x70] sm:$0xff]  ;;  %v163_v45 = vld [vmem:[#allocation2 + $0x58] sm:$0xff]  ;;  %v162_v46 = vld [vmem:[#allocation2 + $0x40] sm:$0xff] }
  0x15   :  { %178 = vmatpush.msra.mxu2 %v173_v35  ;;  %v161_v47 = vld [vmem:[#allocation2 + $0x28] sm:$0xff]  ;;  %v160_v48 = vld [vmem:[#allocation2 + $0x10] sm:$0xff]  ;;  %v42_v49 = vld [vmem:[%s348_s0] sm:$0xff] }
  0x16   :  { %87 = vmatpush.msra.mxu0 %v61_v13  ;;  %106 = vmatpush.msra.mxu1 %v64_v18  ;;  %v241_v2 = vld [vmem:[%s351_s3] ss:$0 sm:$0xff]  ;;  %v45_v4 = vld [vmem:[%s348_s0 + $0x18] sm:$0xff]  ;;  %v242_v7 = vld [vmem:[%s351_s3 + $0x1] ss:$0 sm:$0xff] }
  0x17   :  { %179 = vmatpush.msra.mxu2 %v172_v36  ;;  %v199_v3 = vmul.f32 %v241_v2, %v317_v28  ;;  %v43_v8 = vld [vmem:[%s348_s0 + $0x8] sm:$0xff]  ;;  %v46_v12 = vld [vmem:[%s348_s0 + $0x20] sm:$0xff] }
  0x18   :  { %88 = vmatpush.msra.mxu0 %v59_v15  ;;  %107 = vmatpush.msra.mxu1 %v62_v20 }
  0x19   :  { %180 = vmatpush.msra.mxu2 %v171_v37  ;;  %v200_v5 = vadd.f32 %v199_v3, %v45_v4 }
  0x1a   :  { %89 = vmatpush.msra.mxu0 %v57_v17  ;;  %108 = vmatpush.msra.mxu1 %v60_v22 }
  0x1b   :  { %181 = vmatpush.msra.mxu2 %v170_v38  ;;  %v201_v6 = vmax.f32 %v200_v5, 0.0 }
  0x1c   :  { %90 = vmatpush.msra.mxu0 %v55_v19  ;;  %109 = vmatpush.msra.mxu1 %v58_v24 }
  0x1d   :  { %182 = vmatpush.msra.mxu2 %v169_v39  ;;  %v203_v10 = vmul.f32 %v242_v7, %v201_v6 }
  0x1e   :  { %91 = vmatpush.msra.mxu0 %v53_v21  ;;  %110 = vmatpush.msra.mxu1 %v56_v26 }
  0x1f   :  { %183 = vmatpush.msra.mxu2 %v168_v40  ;;  %v204_v13 = vadd.f32 %v203_v10, %v46_v12 }
  0x20   :  { %92 = vmatpush.msra.mxu0 %v51_v23  ;;  %111 = vmatpush.msra.mxu1 %v54_v29  ;;  %v44_v29 = vld [vmem:[%s348_s0 + $0x10] sm:$0xff] }
  0x21   :  { %184 = vmatpush.msra.mxu2 %v167_v41  ;;  %v237_v15 = vmul.f32 -1.442695, %v204_v13 }
  0x22   :  { %93 = vmatpush.msra.mxu0 %v49_v25  ;;  %112 = vmatpush.msra.mxu1 %v52_v30 }
  0x23   :  { %185 = vmatpush.msra.mxu2 %v166_v42 }
  0x24   :  { %94 = vmatpush.msra.mxu0 %v47_v27  ;;  %113 = vmatpush.msra.mxu1 %v50_v31 }
  0x25   :  { %95 = vmatmul.f32.vlgmr.msra.gmra.mxu0 %v317_v28  ;;  %186 = vmatpush.msra.mxu2 %v165_v43 }
  0x26   :  { %114 = vmatpush.msra.mxu1 %v48_v32 }
  0x27   :  { %115 = vmatmul.f32.vlgmr.msra.gmra.mxu1 %v317_v28  ;;  %187 = vmatpush.msra.mxu2 %v164_v44 }
  0x29   :  { %188 = vmatpush.msra.mxu2 %v163_v45 }
  0x2b   :  { %189 = vmatpush.msra.mxu2 %v162_v46 }
  0x2d   :  { %190 = vmatpush.msra.mxu2 %v161_v47 }
  0x2f   :  { %191 = vmatpush.msra.mxu2 %v160_v48 }
  0xa2   :  { %v96_v50 = vpop.f32.mrf.mxu0 }
  0xa3   :  { %v119_v51 = vadd.f32 %v96_v50, %v42_v49 }
  0xa4   :  { %v116_v9 = vpop.f32.mrf.mxu1 }
  0xa5   :  { %v235_v52 = vmul.f32 -1.442695, %v119_v51  ;;  %v139_v11 = vadd.f32 %v116_v9, %v43_v8 }
  0xa7   :  { %243 = vpow2.f32 %v235_v52  ;;  %v236_v14 = vmul.f32 -1.442695, %v139_v11 }
  0xad   :  { %v244_v53 = vpop.eup %243 }
  0xae   :  { %v123_v54 = vadd.f32 1.0, %v244_v53 }
  0xb0   :  { %245 = vrcp.f32 %v123_v54  ;;  %v135_v58 = vand.u32 2147483648, %v123_v54  ;;  %v133_v60 = vand.u32 2147483647, %v123_v54  ;;  %vm129_vm1 = vweird.f32 %v123_v54 }
  0xb1   :  { %247 = vpow2.f32 %v236_v14 }
  0xb2   :  { %v136_v62 = vor.u32 1.1754944e-38, %v135_v58  ;;  %vm134_vm3 = vcmp.eq.f32.partialorder %v133_v60, 8.507059e+37  ;;  %249 = vpow2.f32 %v237_v15 }
  0xb6   :  { %v246_v55 = vpop.eup %245 }
  0xb7   :  { %v125_v56 = vmul.f32 %v246_v55, %v123_v54  ;;  %vm130_vm0 = vweird.f32 %v246_v55  ;;  %v248_v16 = vpop.eup %247 }
  0xb8   :  { %vm131_vm2 = vmor %vm129_vm1, %vm130_vm0  ;;  %v143_v17 = vadd.f32 1.0, %v248_v16  ;;  %v250_v18 = vpop.eup %249 }
  0xb9   :  { %v126_v57 = vsub.f32 1.0, %v125_v56  ;;  %v208_v19 = vadd.f32 1.0, %v250_v18 }
  0xba   :  { %251 = vrcp.f32 %v143_v17  ;;  %vm149_vm4 = vweird.f32 %v143_v17  ;;  %v155_v27 = vand.u32 2147483648, %v143_v17  ;;  %v153_v31 = vand.u32 2147483647, %v143_v17 }
  0xbb   :  { %v127_v59 = vmul.f32 %v246_v55, %v126_v57  ;;  %253 = vrcp.f32 %v208_v19  ;;  %vm214_vm7 = vweird.f32 %v208_v19  ;;  %v220_v36 = vand.u32 2147483648, %v208_v19 }
  0xbc   :  { %v156_v34 = vor.u32 1.1754944e-38, %v155_v27  ;;  %vm154_vm9 = vcmp.eq.f32.partialorder %v153_v31, 8.507059e+37  ;;  %v218_v39 = vand.u32 2147483647, %v208_v19 }
  0xbd   :  { %v128_v61 = vadd.f32 %v246_v55, %v127_v59  ;;  %v221_v41 = vor.u32 1.1754944e-38, %v220_v36 }
  0xbe   :  { %vm219_vm11 = vcmp.eq.f32.partialorder %v218_v39, 8.507059e+37 }
  0xbf   :  { %v132_v63 = vsel %vm131_vm2, %v246_v55, %v128_v61 }
  0xc0   :  { %v137_v0 = vsel %vm134_vm3, %v136_v62, %v132_v63  ;;  %v252_v20 = vpop.eup %251 }
  0xc1   :  { %v159_v1 = vmul.f32 %v137_v0, %v317_v28  ;;  %v145_v21 = vmul.f32 %v252_v20, %v143_v17  ;;  %v254_v22 = vpop.eup %253  ;;  %vm150_vm5 = vweird.f32 %v252_v20 }
  0xc2   :  { %v210_v24 = vmul.f32 %v254_v22, %v208_v19  ;;  %vm151_vm6 = vmor %vm149_vm4, %vm150_vm5  ;;  %vm215_vm8 = vweird.f32 %v254_v22 }
  0xc3   :  { %192 = vmatmul.f32.vlgmr.msra.gmra.mxu2 %v159_v1  ;;  %v146_v23 = vsub.f32 1.0, %v145_v21  ;;  %vm216_vm10 = vmor %vm214_vm7, %vm215_vm8 }
  0xc4   :  { %v211_v26 = vsub.f32 1.0, %v210_v24 }
  0xc5   :  { %v147_v25 = vmul.f32 %v252_v20, %v146_v23 }
  0xc6   :  { %v212_v32 = vmul.f32 %v254_v22, %v211_v26 }
  0xc7   :  { %v148_v30 = vadd.f32 %v252_v20, %v147_v25 }
  0xc8   :  { %v213_v38 = vadd.f32 %v254_v22, %v212_v32 }
  0xc9   :  { %v152_v37 = vsel %vm151_vm6, %v252_v20, %v148_v30 }
  0xca   :  { %v157_v40 = vsel %vm154_vm9, %v156_v34, %v152_v37  ;;  %v217_v42 = vsel %vm216_vm10, %v254_v22, %v213_v38 }
  0xcb   :  { %v225_v43 = vsub.f32 1.0, %v157_v40  ;;  %v222_v45 = vsel %vm219_vm11, %v221_v41, %v217_v42  ;;  %v224_v47 = vmul.f32 %v157_v40, %v317_v28 }
 0x146   :  { %v193_v33 = vpop.f32.mrf.mxu2 }
 0x147   :  { %v196_v35 = vadd.f32 %v193_v33, %v44_v29 }
 0x149   :  { %255 = vtanh.f32 %v196_v35 }
 0x14f   :  { %v256_v44 = vpop.eup %255 }
 0x150   :  { %v226_v46 = vmul.f32 %v256_v44, %v225_v43 }
 0x152   :  { %v227_v48 = vmul.f32 %v226_v46, %v222_v45 }
 0x154   :  { %v228_v49 = vadd.f32 %v227_v48, %v224_v47 }
 0x156   :  { %229 = vst [vmem:[%s352_s4] sm:$0xff] %v228_v49 }
 0x157   :  { %234 = vsyncpa [#allocation3], 1 }

</bundles_post_ra>
